<compile_context>
chip_gen: v5e
topology: v5e:2x2
jax: 0.10.0
libtpu: 0.0.40
codegen_flags: <defaults>
</compile_context>

<pallas_src>
import math

import jax
import jax.numpy as jnp
from jax.experimental import pallas as pl
from jax.experimental.pallas import tpu as pltpu


def _rnn_kernel(x_ref, h0_ref, wx_ref, wh_ref, b_ref, out_ref):
    """
    Refs (all whole-array VMEM blocks, single invocation):
      x_ref:   (N*T, D)  batch-major flattened inputs (row n*T + t == x[n, t, :])
      h0_ref:  (N, H)    initial hidden state
      wx_ref:  (D, H)
      wh_ref:  (H, H)
      b_ref:   (1, H)
      out_ref: (N, T*H)  out[n, t*H:(t+1)*H] == h_t[n, :]   (lane-dense store)
    """
    N, H = h0_ref.shape
    NT = x_ref.shape[0]
    T = NT // N

    # --- Hoisted input projection: one MXU matmul for every (n, t) pair,
    #     instead of T tiny per-step matmuls. Bias added once, f32 accumulate.
    xw = (
        jnp.dot(x_ref[...], wx_ref[...], preferred_element_type=jnp.float32)
        + b_ref[...]
    )  # (N*T, H) float32

    wh = wh_ref[...]
    h = h0_ref[...]  # hidden state carried purely in vregs across the unrolled loop

    outs = []
    for t in range(T):  # fully unrolled recurrence (sequential by definition)
        # Gather the (N, H) projection slab for timestep t: rows {n*T + t}.
        # Static single-row slices + sublane concat — reshape-free, robust lowering.
        rows = [xw[n * T + t : n * T + t + 1, :] for n in range(N)]
        xp_t = rows[0] if N == 1 else jnp.concatenate(rows, axis=0)  # (N, H) f32

        h = jnp.tanh(xp_t + jnp.dot(h, wh, preferred_element_type=jnp.float32))
        outs.append(h)

    # --- Single lane-dense bulk store of all timesteps: (N, T*H). ---
    out_ref[...] = jnp.concatenate(outs, axis=-1).astype(out_ref.dtype)


def rnn_forward_pallas(x, h0, Wx, Wh, b):
    """
    Args:
        x:  (N, T, D)  input sequence (word embeddings)
        h0: (N, H)     initial hidden state
        Wx: (D, H)
        Wh: (H, H)
        b:  (H,)

    Returns:
        h: (N, T, H) hidden states for all timesteps (matches rnn_forward).
    """
    N, T, D = x.shape
    H = h0.shape[1]

    # Free (metadata-only) row-major reshapes — no transposes, no extra HBM pass.
    x2d = x.reshape(N * T, D)
    b2d = b.reshape(1, H)

    out2d = pl.pallas_call(
        _rnn_kernel,
        out_shape=jax.ShapeDtypeStruct((N, T * H), x.dtype),
        # Single grid point: whole arrays live in VMEM (tiny at these shapes);
        # no grid -> no per-step pipeline overhead, no input double-buffering.
        in_specs=[pl.BlockSpec(memory_space=pltpu.MemorySpace.VMEM)] * 5,
        out_specs=pl.BlockSpec(memory_space=pltpu.MemorySpace.VMEM),
    )(x2d, h0, Wx, Wh, b2d)

    # Free row-major split of the last dim: (N, T*H) -> (N, T, H).
    return out2d.reshape(N, T, H)


def rnn_forward_ref(x, h0, Wx, Wh, b):
    """Pure-JAX reference matching the PyTorch rnn_forward semantics."""

    def step(prev_h, xt):
        next_h = jnp.tanh(xt @ Wx + prev_h @ Wh + b)
        return next_h, next_h

    x_tmajor = jnp.transpose(x, (1, 0, 2))  # (T, N, D)
    _, h_tmajor = jax.lax.scan(step, h0, x_tmajor)
    return jnp.transpose(h_tmajor, (1, 0, 2))


if __name__ == "__main__":
    # Small shapes consistent with the module's RNN: N=2, T=8, D=16, H=32.
    N, T, D, H = 2, 8, 16, 32

    key = jax.random.PRNGKey(0)
    k_x, k_h0, k_wx, k_wh = jax.random.split(key, 4)

    x = jax.random.normal(k_x, (N, T, D), dtype=jnp.float32)
    h0 = jax.random.normal(k_h0, (N, H), dtype=jnp.float32)

    # Deterministic parameter init matching RNN.__init__:
    #   Wx ~ randn(D, H) / sqrt(D), Wh ~ randn(H, H) / sqrt(H), b = 0
    Wx = jax.random.normal(k_wx, (D, H), dtype=jnp.float32) / math.sqrt(D)
    Wh = jax.random.normal(k_wh, (H, H), dtype=jnp.float32) / math.sqrt(H)
    b = jnp.zeros((H,), dtype=jnp.float32)

    h = jax.block_until_ready(rnn_forward_pallas(x, h0, Wx, Wh, b))

    h_ref = rnn_forward_ref(x, h0, Wx, Wh, b)
    assert h.shape == (N, T, H)
    assert jnp.allclose(h, h_ref, atol=1e-5, rtol=1e-5), "mismatch vs reference"

    print("KERNEL_OK")
</pallas_src>

<mosaic_0001>
module attributes {stable_mosaic.version = 11 : i64} {
  func.func @_rnn_kernel(%arg0: memref<16x16xf32, #tpu.memory_space<vmem>>, %arg1: memref<2x32xf32, #tpu.memory_space<vmem>>, %arg2: memref<16x32xf32, #tpu.memory_space<vmem>>, %arg3: memref<32x32xf32, #tpu.memory_space<vmem>>, %arg4: memref<1x32xf32, #tpu.memory_space<vmem>>, %arg5: memref<2x256xf32, #tpu.memory_space<vmem>>) attributes {dimension_semantics = [], scalar_prefetch = 0 : i64, scratch_operands = 0 : i64, tpu.core_type = #tpu.core_type<tc>} {
    %c0 = arith.constant 0 : index
    %c0_0 = arith.constant 0 : index
    %0 = vector.load %arg0[%c0, %c0_0] : memref<16x16xf32, #tpu.memory_space<vmem>>, vector<16x16xf32>
    %c0_1 = arith.constant 0 : index
    %c0_2 = arith.constant 0 : index
    %1 = vector.load %arg2[%c0_1, %c0_2] : memref<16x32xf32, #tpu.memory_space<vmem>>, vector<16x32xf32>
    %cst = arith.constant dense<0.000000e+00> : vector<16x32xf32>
    %2 = tpu.matmul %0, %1, %cst {dimension_numbers = #tpu.dot_dimension_numbers<[1], [0], [0], [1], [0, 0, 1, 1], [], []>} : vector<16x16xf32>, vector<16x32xf32>, vector<16x32xf32> -> vector<16x32xf32>
    %c0_3 = arith.constant 0 : index
    %c0_4 = arith.constant 0 : index
    %3 = vector.load %arg4[%c0_3, %c0_4] : memref<1x32xf32, #tpu.memory_space<vmem>>, vector<1x32xf32>
    %4 = vector.broadcast %3 : vector<1x32xf32> to vector<16x32xf32>
    %5 = arith.addf %2, %4 : vector<16x32xf32>
    %c0_5 = arith.constant 0 : index
    %c0_6 = arith.constant 0 : index
    %6 = vector.load %arg3[%c0_5, %c0_6] : memref<32x32xf32, #tpu.memory_space<vmem>>, vector<32x32xf32>
    %c0_7 = arith.constant 0 : index
    %c0_8 = arith.constant 0 : index
    %7 = vector.load %arg1[%c0_7, %c0_8] : memref<2x32xf32, #tpu.memory_space<vmem>>, vector<2x32xf32>
    %8 = vector.extract_strided_slice %5 {offsets = [0, 0], sizes = [1, 32], strides = [1, 1]} : vector<16x32xf32> to vector<1x32xf32>
    %9 = vector.extract_strided_slice %5 {offsets = [8, 0], sizes = [1, 32], strides = [1, 1]} : vector<16x32xf32> to vector<1x32xf32>
    %10 = tpu.concatenate %8, %9 in 0 : vector<1x32xf32>, vector<1x32xf32> -> vector<2x32xf32>
    %cst_9 = arith.constant dense<0.000000e+00> : vector<2x32xf32>
    %11 = tpu.matmul %7, %6, %cst_9 {dimension_numbers = #tpu.dot_dimension_numbers<[1], [0], [0], [1], [0, 0, 1, 1], [], []>} : vector<2x32xf32>, vector<32x32xf32>, vector<2x32xf32> -> vector<2x32xf32>
    %12 = arith.addf %10, %11 : vector<2x32xf32>
    %13 = math.tanh %12 : vector<2x32xf32>
    %14 = vector.extract_strided_slice %5 {offsets = [1, 0], sizes = [1, 32], strides = [1, 1]} : vector<16x32xf32> to vector<1x32xf32>
    %15 = vector.extract_strided_slice %5 {offsets = [9, 0], sizes = [1, 32], strides = [1, 1]} : vector<16x32xf32> to vector<1x32xf32>
    %16 = tpu.concatenate %14, %15 in 0 : vector<1x32xf32>, vector<1x32xf32> -> vector<2x32xf32>
    %cst_10 = arith.constant dense<0.000000e+00> : vector<2x32xf32>
    %17 = tpu.matmul %13, %6, %cst_10 {dimension_numbers = #tpu.dot_dimension_numbers<[1], [0], [0], [1], [0, 0, 1, 1], [], []>} : vector<2x32xf32>, vector<32x32xf32>, vector<2x32xf32> -> vector<2x32xf32>
    %18 = arith.addf %16, %17 : vector<2x32xf32>
    %19 = math.tanh %18 : vector<2x32xf32>
    %20 = vector.extract_strided_slice %5 {offsets = [2, 0], sizes = [1, 32], strides = [1, 1]} : vector<16x32xf32> to vector<1x32xf32>
    %21 = vector.extract_strided_slice %5 {offsets = [10, 0], sizes = [1, 32], strides = [1, 1]} : vector<16x32xf32> to vector<1x32xf32>
    %22 = tpu.concatenate %20, %21 in 0 : vector<1x32xf32>, vector<1x32xf32> -> vector<2x32xf32>
    %cst_11 = arith.constant dense<0.000000e+00> : vector<2x32xf32>
    %23 = tpu.matmul %19, %6, %cst_11 {dimension_numbers = #tpu.dot_dimension_numbers<[1], [0], [0], [1], [0, 0, 1, 1], [], []>} : vector<2x32xf32>, vector<32x32xf32>, vector<2x32xf32> -> vector<2x32xf32>
    %24 = arith.addf %22, %23 : vector<2x32xf32>
    %25 = math.tanh %24 : vector<2x32xf32>
    %26 = vector.extract_strided_slice %5 {offsets = [3, 0], sizes = [1, 32], strides = [1, 1]} : vector<16x32xf32> to vector<1x32xf32>
    %27 = vector.extract_strided_slice %5 {offsets = [11, 0], sizes = [1, 32], strides = [1, 1]} : vector<16x32xf32> to vector<1x32xf32>
    %28 = tpu.concatenate %26, %27 in 0 : vector<1x32xf32>, vector<1x32xf32> -> vector<2x32xf32>
    %cst_12 = arith.constant dense<0.000000e+00> : vector<2x32xf32>
    %29 = tpu.matmul %25, %6, %cst_12 {dimension_numbers = #tpu.dot_dimension_numbers<[1], [0], [0], [1], [0, 0, 1, 1], [], []>} : vector<2x32xf32>, vector<32x32xf32>, vector<2x32xf32> -> vector<2x32xf32>
    %30 = arith.addf %28, %29 : vector<2x32xf32>
    %31 = math.tanh %30 : vector<2x32xf32>
    %32 = vector.extract_strided_slice %5 {offsets = [4, 0], sizes = [1, 32], strides = [1, 1]} : vector<16x32xf32> to vector<1x32xf32>
    %33 = vector.extract_strided_slice %5 {offsets = [12, 0], sizes = [1, 32], strides = [1, 1]} : vector<16x32xf32> to vector<1x32xf32>
    %34 = tpu.concatenate %32, %33 in 0 : vector<1x32xf32>, vector<1x32xf32> -> vector<2x32xf32>
    %cst_13 = arith.constant dense<0.000000e+00> : vector<2x32xf32>
    %35 = tpu.matmul %31, %6, %cst_13 {dimension_numbers = #tpu.dot_dimension_numbers<[1], [0], [0], [1], [0, 0, 1, 1], [], []>} : vector<2x32xf32>, vector<32x32xf32>, vector<2x32xf32> -> vector<2x32xf32>
    %36 = arith.addf %34, %35 : vector<2x32xf32>
    %37 = math.tanh %36 : vector<2x32xf32>
    %38 = vector.extract_strided_slice %5 {offsets = [5, 0], sizes = [1, 32], strides = [1, 1]} : vector<16x32xf32> to vector<1x32xf32>
    %39 = vector.extract_strided_slice %5 {offsets = [13, 0], sizes = [1, 32], strides = [1, 1]} : vector<16x32xf32> to vector<1x32xf32>
    %40 = tpu.concatenate %38, %39 in 0 : vector<1x32xf32>, vector<1x32xf32> -> vector<2x32xf32>
    %cst_14 = arith.constant dense<0.000000e+00> : vector<2x32xf32>
    %41 = tpu.matmul %37, %6, %cst_14 {dimension_numbers = #tpu.dot_dimension_numbers<[1], [0], [0], [1], [0, 0, 1, 1], [], []>} : vector<2x32xf32>, vector<32x32xf32>, vector<2x32xf32> -> vector<2x32xf32>
    %42 = arith.addf %40, %41 : vector<2x32xf32>
    %43 = math.tanh %42 : vector<2x32xf32>
    %44 = vector.extract_strided_slice %5 {offsets = [6, 0], sizes = [1, 32], strides = [1, 1]} : vector<16x32xf32> to vector<1x32xf32>
    %45 = vector.extract_strided_slice %5 {offsets = [14, 0], sizes = [1, 32], strides = [1, 1]} : vector<16x32xf32> to vector<1x32xf32>
    %46 = tpu.concatenate %44, %45 in 0 : vector<1x32xf32>, vector<1x32xf32> -> vector<2x32xf32>
    %cst_15 = arith.constant dense<0.000000e+00> : vector<2x32xf32>
    %47 = tpu.matmul %43, %6, %cst_15 {dimension_numbers = #tpu.dot_dimension_numbers<[1], [0], [0], [1], [0, 0, 1, 1], [], []>} : vector<2x32xf32>, vector<32x32xf32>, vector<2x32xf32> -> vector<2x32xf32>
    %48 = arith.addf %46, %47 : vector<2x32xf32>
    %49 = math.tanh %48 : vector<2x32xf32>
    %50 = vector.extract_strided_slice %5 {offsets = [7, 0], sizes = [1, 32], strides = [1, 1]} : vector<16x32xf32> to vector<1x32xf32>
    %51 = vector.extract_strided_slice %5 {offsets = [15, 0], sizes = [1, 32], strides = [1, 1]} : vector<16x32xf32> to vector<1x32xf32>
    %52 = tpu.concatenate %50, %51 in 0 : vector<1x32xf32>, vector<1x32xf32> -> vector<2x32xf32>
    %cst_16 = arith.constant dense<0.000000e+00> : vector<2x32xf32>
    %53 = tpu.matmul %49, %6, %cst_16 {dimension_numbers = #tpu.dot_dimension_numbers<[1], [0], [0], [1], [0, 0, 1, 1], [], []>} : vector<2x32xf32>, vector<32x32xf32>, vector<2x32xf32> -> vector<2x32xf32>
    %54 = arith.addf %52, %53 : vector<2x32xf32>
    %55 = math.tanh %54 : vector<2x32xf32>
    %56 = tpu.concatenate %13, %19, %25, %31, %37, %43, %49, %55 in 1 : vector<2x32xf32>, vector<2x32xf32>, vector<2x32xf32>, vector<2x32xf32>, vector<2x32xf32>, vector<2x32xf32>, vector<2x32xf32>, vector<2x32xf32> -> vector<2x256xf32>
    %c0_17 = arith.constant 0 : index
    %c0_18 = arith.constant 0 : index
    %57 = vector.load %arg5[%c0_17, %c0_18] : memref<2x256xf32, #tpu.memory_space<vmem>>, vector<2x256xf32>
    tpu.vector_store %arg5[%c0_17, %c0_18], %56 {strides = array<i32>} : memref<2x256xf32, #tpu.memory_space<vmem>>, vector<2x256xf32>,
    return
  }
}

</mosaic_0001>

<bundles_post_ra>
// kernel: tpu_custom_call.1
= control target key start
LH: loop header
LB: loop body
LE: loop exit
PB: predicated region body
PF: predicated region fallthrough
CT: control target
= control target key end

     0   :  { %10 = vsyncpa [#allocation3], 0  ;;  %s661_s0 = inlined_call_operand.hbm [shape: f32[16,16], index: 0, kind: input, shape index: {}]   ;;  %s662_s1 = inlined_call_operand.hbm [shape: f32[2,32], index: 1, kind: input, shape index: {}]   ;;  %s663_s2 = inlined_call_operand.hbm [shape: f32[16,32], index: 2, kind: input, shape index: {}]   ;;  %s664_s3 = inlined_call_operand.hbm [shape: f32[32,32], index: 3, kind: input, shape index: {}]   ;;  %s665_s4 = inlined_call_operand.vmem [shape: f32[1,32], index: 4, kind: input, shape index: {}]   ;;  %s666_s5 = inlined_call_operand.hbm [shape: f32[2,256], index: 5, kind: output, shape index: {}]  }
   0x1   :  { %11 = vsyncpa [#allocation6], 0 }
   0x2   :  { %12 = vsyncpa [#allocation9], 0  ;;  %s32_s20 = sshll.u32 %s662_s1, 4  ;;  %s33_s20 = int_to_ptr.hbm [resolvable:$true] %s32_s20 }
   0x3   :  { %13 = vsyncpa [#allocation4], 0  ;;  %s583_s21 = smov [#allocation5]   ;;  %s18_s25 = sshll.u32 %s661_s0, 4  ;;  %s19_s25 = int_to_ptr.hbm [resolvable:$true] %s18_s25 }
   0x4   :  { %s34_s22 = sshll.u32 %s583_s21, 4  ;;  %s584_s26 = smov [#allocation2]   ;;  %s35_s22 = int_to_ptr.vmem [resolvable:$true] %s34_s22 }
   0x5   :  { %37 = dma.hbm_to_vmem [thread:$0]  %s33_s20, 32, %s35_s22, [#allocation6]  }
   0x6   :  { %s20_s27 = sshll.u32 %s584_s26, 4  ;;  %s585_s28 = smov 128   ;;  %s21_s27 = int_to_ptr.vmem [resolvable:$true] %s20_s27 }
   0x7   :  { %s586_s29 = smov 8   ;;  %s42_s1 = sshll.u32 %s663_s2, 4  ;;  %s43_s1 = int_to_ptr.hbm [resolvable:$true] %s42_s1 }
   0x8   :  { %26 = dma.hbm_to_vmem [thread:$0]  %s19_s25, 256, %s21_s27, [#allocation3], %s585_s28, %s585_s28, %s586_s29  }
   0x9   :  { %s587_s7 = smov [#allocation7]   ;;  %s55_s0 = sshll.u32 %s664_s3, 4  ;;  %s56_s0 = int_to_ptr.hbm [resolvable:$true] %s55_s0 }
   0xa   :  { %s44_s8 = sshll.u32 %s587_s7, 4  ;;  %s588_s11 = smov [#allocation8]   ;;  %s45_s8 = int_to_ptr.vmem [resolvable:$true] %s44_s8 }
   0xb   :  { %50 = dma.hbm_to_vmem [thread:$0]  %s43_s1, 256, %s45_s8, [#allocation6], %s585_s28, %s585_s28, %s586_s29  }
   0xc   :  { %s57_s12 = sshll.u32 %s588_s11, 4  ;;  %s58_s12 = int_to_ptr.vmem [resolvable:$true] %s57_s12 }
   0xd   :  { %63 = dma.hbm_to_vmem [thread:$0]  %s56_s0, 512, %s58_s12, [#allocation9], %s585_s28, %s585_s28, %s586_s29  }
   0xe   :  { %575 = dma.done.wait [#allocation3], 256  }
   0xf   :  { %576 = vsyncadd [#allocation3], 4294967040 }
  0x10   :  { %577 = dma.done.wait [#allocation6], 288  }
  0x11   :  { %578 = vsyncadd [#allocation6], 4294967008 }
  0x12   :  { %579 = dma.done.wait [#allocation9], 512  }
  0x13   :  { %580 = vsyncadd [#allocation9], 4294966784  ;;  %v85_v0 = vld [vmem:[#allocation7 + $0x8] sm:$0xff]  ;;  %v84_v1 = vld [vmem:[#allocation7] sm:$0xff]  ;;  %vm90_vm0 = vcmask 130048   ;;  %vm130_vm1 = vcmask 261120  }
  0x14   :  { %111 = vmatpush.msra.mxu0 %v85_v0  ;;  %v82_v2 = vld [vmem:[#allocation2] sm:$0xff]  ;;  %v122_v4 = vld [vmem:[#allocation8 + $0x10] sm:$0xff]  ;;  %v121_v5 = vld [vmem:[#allocation8 + $0x8] sm:$0xff]  ;;  %vm128_vm2 = vcmask 1040384   ;;  %s590_s13 = smov 64   ;;  %s591_s14 = smov 96  }
  0x15   :  { %v123_v3 = vld [vmem:[#allocation8 + $0x18] sm:$0xff]  ;;  %v120_v6 = vld [vmem:[#allocation8] sm:$0xff]  ;;  %v124_v7 = vld [vmem:[#allocation5] sm:$0x3]  ;;  %vm385_vm3 = vcmask 523264   ;;  %vm387_vm4 = vcmask 785408  }
  0x16   :  { %146 = vmatpush.msra.mxu1 %v123_v3  ;;  %175 = vmatpush.msra.mxu2 %v123_v3  ;;  %v83_v8 = vld [vmem:[#allocation2 + $0x8] sm:$0xff]  ;;  %v438_v10 = vld [vmem:[%s665_s4] ss:$0 sm:$0xff]  ;;  %s589_s4 = smov 32   ;;  %s592_s15 = smov [#allocation10]   ;;  %vm395_vm5 = vcmask 1041408  }
  0x17   :  { %112 = vmatpush.msra.mxu0 %v84_v1  ;;  %205 = vmatpush.msra.mxu3 %v123_v3  ;;  %s404_s16 = sshll.u32 %s592_s15, 4  ;;  %s406_s19 = sshll.u32 %s666_s5, 4  ;;  %s405_s16 = int_to_ptr.vmem [resolvable:$true] %s404_s16  ;;  %s407_s19 = int_to_ptr.hbm [resolvable:$true] %s406_s19 }
  0x18   :  { %418 = vmatmul.msk.f32.vlgmr.msra.gmra.mxu0 %vm90_vm0, %v82_v2  ;;  %147 = vmatpush.msra.mxu1 %v122_v4 }
  0x19   :  { %176 = vmatpush.msra.mxu2 %v122_v4  ;;  %206 = vmatpush.msra.mxu3 %v122_v4 }
  0x1a   :  { %148 = vmatpush.msra.mxu1 %v121_v5  ;;  %325 = vmatpush.msrb.mxu0 %v123_v3 }
  0x1b   :  { %177 = vmatpush.msra.mxu2 %v121_v5  ;;  %207 = vmatpush.msra.mxu3 %v121_v5 }
  0x1c   :  { %149 = vmatpush.msra.mxu1 %v120_v6  ;;  %326 = vmatpush.msrb.mxu0 %v122_v4 }
  0x1d   :  { %420 = vmatmul.msk.f32.vlgmr.msra.gmra.mxu1 %vm130_vm1, %v124_v7  ;;  %178 = vmatpush.msra.mxu2 %v120_v6 }
  0x1e   :  { %208 = vmatpush.msra.mxu3 %v120_v6  ;;  %235 = vmatpush.msrb.mxu1 %v123_v3 }
  0x1f   :  { %265 = vmatpush.msrb.mxu2 %v123_v3  ;;  %327 = vmatpush.msrb.mxu0 %v121_v5 }
  0x20   :  { %295 = vmatpush.msrb.mxu3 %v123_v3  ;;  %419 = vmatmul.msk.f32.gmra.mxu0 %vm90_vm0, %v83_v8 }
  0x21   :  { %236 = vmatpush.msrb.mxu1 %v122_v4  ;;  %266 = vmatpush.msrb.mxu2 %v122_v4 }
  0x22   :  { %296 = vmatpush.msrb.mxu3 %v122_v4  ;;  %328 = vmatpush.msrb.mxu0 %v120_v6 }
  0x23   :  { %237 = vmatpush.msrb.mxu1 %v121_v5  ;;  %267 = vmatpush.msrb.mxu2 %v121_v5 }
  0x24   :  { %297 = vmatpush.msrb.mxu3 %v121_v5 }
  0x25   :  { %238 = vmatpush.msrb.mxu1 %v120_v6  ;;  %268 = vmatpush.msrb.mxu2 %v120_v6 }
  0x26   :  { %298 = vmatpush.msrb.mxu3 %v120_v6 }
  0x27   :  { %355 = vmatpush.msra.mxu1 %v123_v3 }
  0x29   :  { %356 = vmatpush.msra.mxu1 %v122_v4 }
  0x2b   :  { %357 = vmatpush.msra.mxu1 %v121_v5 }
  0x2d   :  { %358 = vmatpush.msra.mxu1 %v120_v6 }
  0x95   :  { %v114_v9 = vpop.f32.mrf.mxu0 }
  0x96   :  { %v115_v11 = vadd.f32 %v438_v10, %v114_v9 }
  0x98   :  { %v157_v14 = vrot.slane %v115_v11, 1  ;;  %v185_v15 = vrot.slane %v115_v11, 2  ;;  %v215_v16 = vrot.slane %v115_v11, 3  ;;  %v245_v17 = vrot.slane %v115_v11, 4 }
  0x99   :  { %v275_v18 = vrot.slane %v115_v11, 5  ;;  %v305_v19 = vrot.slane %v115_v11, 6  ;;  %v335_v32 = vrot.slane %v115_v11, 7 }
  0x9a   :  { %v151_v21 = vpop.f32.mrf.mxu1 }
  0x9d   :  { %v117_v12 = vpop.f32.mrf.mxu0 }
  0x9e   :  { %v118_v13 = vadd.f32 %v438_v10, %v117_v12 }
  0xa0   :  { %v126_v20 = vrot.slane %v118_v13, 7  ;;  %v159_v22 = vsel %vm128_vm2, %v157_v14, %v118_v13  ;;  %v187_v23 = vrot.slane %v118_v13, 1  ;;  %v217_v24 = vrot.slane %v118_v13, 2 }
  0xa1   :  { %v247_v25 = vrot.slane %v118_v13, 3  ;;  %v277_v26 = vrot.slane %v118_v13, 4  ;;  %v307_v27 = vrot.slane %v118_v13, 5  ;;  %v337_v28 = vrot.slane %v118_v13, 6 }
  0xa2   :  { %v129_v29 = vsel %vm128_vm2, %v115_v11, %v126_v20  ;;  %v189_v30 = vsel %vm128_vm2, %v185_v15, %v187_v23  ;;  %v219_v31 = vsel %vm128_vm2, %v215_v16, %v217_v24 }
  0xa3   :  { %v154_v33 = vadd.f32 %v151_v21, %v129_v29  ;;  %v249_v34 = vsel %vm128_vm2, %v245_v17, %v247_v25  ;;  %v279_v35 = vsel %vm128_vm2, %v275_v18, %v277_v26  ;;  %v309_v36 = vsel %vm128_vm2, %v305_v19, %v307_v27 }
  0xa4   :  { %v339_v37 = vsel %vm128_vm2, %v335_v32, %v337_v28 }
  0xa5   :  { %439 = vtanh.f32 %v154_v33 }
  0xab   :  { %v440_v38 = vpop.eup %439 }
  0xac   :  { %421 = vmatmul.msk.f32.vlgmr.msra.gmra.mxu2 %vm130_vm1, %v440_v38 }
 0x12f   :  { %v180_v39 = vpop.f32.mrf.mxu2 }
 0x130   :  { %v183_v40 = vadd.f32 %v180_v39, %v159_v22 }
 0x132   :  { %441 = vtanh.f32 %v183_v40 }
 0x138   :  { %v442_v41 = vpop.eup %441 }
 0x139   :  { %365 = vrot.lane.b32.xlu1 %v442_v41, %s589_s4  ;;  %422 = vmatmul.msk.f32.vlgmr.msra.gmra.mxu3 %vm130_vm1, %v442_v41 }
 0x1ab   :  { %v366_v61 = vpop.permute.xlu1 %365 }
 0x1ac   :  { %v384_v4 = vsel %vm130_vm1, %v440_v38, %v366_v61 }
 0x1bc   :  { %v210_v42 = vpop.f32.mrf.mxu3 }
 0x1bd   :  { %v213_v43 = vadd.f32 %v210_v42, %v189_v30 }
 0x1bf   :  { %443 = vtanh.f32 %v213_v43 }
 0x1c5   :  { %v444_v44 = vpop.eup %443 }
 0x1c6   :  { %368 = vrot.lane.b32.xlu2 %v444_v44, %s590_s13  ;;  %423 = vmatmul.msk.f32.vlgmr.msrb.gmra.mxu1 %vm130_vm1, %v444_v44 }
 0x220   :  { %v369_v62 = vpop.permute.xlu2 %368 }
 0x221   :  { %v386_v6 = vsel %vm385_vm3, %v384_v4, %v369_v62 }
 0x243   :  { %v240_v45 = vpop.f32.mrf.mxu1 }
 0x244   :  { %v243_v46 = vadd.f32 %v240_v45, %v219_v31 }
 0x246   :  { %445 = vtanh.f32 %v243_v46 }
 0x24c   :  { %v446_v47 = vpop.eup %445 }
 0x24d   :  { %371 = vrot.lane.b32.xlu2 %v446_v47, %s591_s14  ;;  %424 = vmatmul.msk.f32.vlgmr.msrb.gmra.mxu2 %vm130_vm1, %v446_v47 }
 0x2a7   :  { %v372_v1 = vpop.permute.xlu2 %371 }
 0x2a8   :  { %v388_v8 = vsel %vm387_vm4, %v386_v6, %v372_v1 }
 0x2d0   :  { %v270_v48 = vpop.f32.mrf.mxu2 }
 0x2d1   :  { %v273_v49 = vadd.f32 %v270_v48, %v249_v34 }
 0x2d3   :  { %447 = vtanh.f32 %v273_v49 }
 0x2d9   :  { %v448_v50 = vpop.eup %447 }
 0x2da   :  { %425 = vmatmul.msk.f32.vlgmr.msrb.gmra.mxu3 %vm130_vm1, %v448_v50 }
 0x35d   :  { %v300_v51 = vpop.f32.mrf.mxu3 }
 0x35e   :  { %v303_v52 = vadd.f32 %v300_v51, %v279_v35 }
 0x360   :  { %449 = vtanh.f32 %v303_v52 }
 0x366   :  { %v450_v53 = vpop.eup %449 }
 0x367   :  { %374 = vrot.lane.b32.xlu0 %v450_v53, %s589_s4  ;;  %426 = vmatmul.msk.f32.vlgmr.msrb.gmra.mxu0 %vm130_vm1, %v450_v53 }
 0x3d9   :  { %v375_v60 = vpop.permute.xlu0 %374 }
 0x3da   :  { %v389_v0 = vsel %vm130_vm1, %v448_v50, %v375_v60 }
 0x3e4   :  { %v330_v54 = vpop.f32.mrf.mxu0 }
 0x3e5   :  { %v333_v55 = vadd.f32 %v330_v54, %v309_v36 }
 0x3e7   :  { %451 = vtanh.f32 %v333_v55 }
 0x3ed   :  { %v452_v56 = vpop.eup %451 }
 0x3ee   :  { %377 = vrot.lane.b32.xlu0 %v452_v56, %s590_s13  ;;  %427 = vmatmul.msk.f32.vlgmr.msra.gmra.mxu1 %vm130_vm1, %v452_v56 }
 0x460   :  { %v378_v63 = vpop.permute.xlu0 %377 }
 0x461   :  { %v390_v2 = vsel %vm385_vm3, %v389_v0, %v378_v63 }
 0x46b   :  { %v360_v57 = vpop.f32.mrf.mxu1 }
 0x46c   :  { %v363_v58 = vadd.f32 %v360_v57, %v339_v37 }
 0x46e   :  { %453 = vtanh.f32 %v363_v58 }
 0x474   :  { %v454_v59 = vpop.eup %453 }
 0x475   :  { %381 = vrot.lane.b32.xlu1 %v454_v59, %s591_s14 }
 0x4e7   :  { %v382_v3 = vpop.permute.xlu1 %381 }
 0x4e8   :  { %v391_v5 = vsel %vm387_vm4, %v390_v2, %v382_v3 }
 0x4e9   :  { %v394_v7 = vrot.slane %v391_v5, 6 }
 0x4eb   :  { %v396_v9 = vsel %vm395_vm5, %v388_v8, %v394_v7 }
 0x4ec   :  { %398 = vst [vmem:[#allocation10] sm:$0xf] %v396_v9 }
 0x4ed   :  { %409 = dma.vmem_to_hbm [thread:$0]  %s405_s16, 64, %s407_s19, [#allocation4]  }
 0x4ee   :  { %581 = dma.done.wait [#allocation4], 64  }
 0x4ef   :  { %582 = vsyncadd [#allocation4], 4294967232 }
 0x4f0   :  { %414 = vsyncpa [#allocation3], 1 }
 0x4f1   :  { %415 = vsyncpa [#allocation6], 1 }
 0x4f2   :  { %416 = vsyncpa [#allocation9], 1 }
 0x4f3   :  { %417 = vsyncpa [#allocation4], 1 }

</bundles_post_ra>
